<compile_context>
chip_gen: v5e
topology: v5e:2x2
jax: 0.10.0
libtpu: 0.0.40
codegen_flags: <defaults>
</compile_context>

<pallas_src>
from itertools import permutations

import numpy as np
import jax
import jax.numpy as jnp
from jax.experimental import pallas as pl
from jax.experimental.pallas import tpu as pltpu


PAIR_TILE = 256                 # rows per grid step on the pair/N axis; multiple
                                # of 128 (lane-dense MXU M dim). 256 fits v7x's
                                # 64 MiB VMEM; bump to 512 on v5e/v6e if desired.
VMEM_LIMIT = 64 * 1024 * 1024   # explicit scoped-VMEM limit (32 MiB default).


# ------------------------------ Pallas kernels ------------------------------

def _ht_info_kernel(ex_ref, ha_ref, ta_ref, mask_ref, hs_ref, out_ref):
    """Pair-attention normalize + matmul for one tile of pair rows.

    ha/ta: [TP, L] bf16 gathered entity-attention rows for this pair tile
    mask : [1, 1, L] f32 (owning example), hs: [1, L, H] bf16 (owning example)
    out  : [TP, H] bf16
    """
    del ex_ref  # only consumed by the index_maps
    w = (ha_ref[...].astype(jnp.float32) * ta_ref[...].astype(jnp.float32)
         * mask_ref[0])                                            # f32 VPU math
    denom = jnp.sum(w, axis=-1, keepdims=True) + 1e-20
    w = w * pl.reciprocal(denom, approx=True)                      # EUP slot
    out_ref[...] = jnp.dot(w.astype(jnp.bfloat16), hs_ref[0],
                           preferred_element_type=jnp.float32
                           ).astype(jnp.bfloat16)                  # bf16 MXU


def _dense_cls_argmax_kernel(xh_ref, xt_ref, wh_ref, bh_ref, wt_ref, bt_ref,
                             wc_ref, sum_ref, bc_ref, out_ref):
    """Fused h/t dense + tanh + GroupLinear classifier + argmax, one N tile.

    xh/xt: [TN, F] bf16   wh/wt: [F, H] bf16   bh/bt: [1, H] f32
    wc   : [G, BS, R*BS] bf16 (cls weight, a-major / (r,b)-minor)
    sum  : [R*BS, R] bf16 block-summation matrix
    bc   : [1, R] f32     out: [TN, 1] int32 (argmax over R)
    """
    h = jnp.tanh(jnp.dot(xh_ref[...], wh_ref[...],
                         preferred_element_type=jnp.float32) + bh_ref[...])
    t = jnp.tanh(jnp.dot(xt_ref[...], wt_ref[...],
                         preferred_element_type=jnp.float32) + bt_ref[...])
    h_bf = h.astype(jnp.bfloat16)

    tn = h.shape[0]
    g_num, bs, _ = wc_ref.shape
    r = bc_ref.shape[1]

    acc = jnp.zeros((tn, r), jnp.float32)
    for gi in range(g_num):        # G is small & static -> unrolled, static slices
        hg = h_bf[:, gi * bs:(gi + 1) * bs]                        # [TN, BS] bf16
        tg = t[:, gi * bs:(gi + 1) * bs]                           # [TN, BS] f32
        # matmul-first: full-width MXU result [TN, R*BS].
        u = jnp.dot(hg, wc_ref[gi], preferred_element_type=jnp.float32)
        t_rep = jnp.concatenate([tg] * r, axis=-1)                 # [TN, R*BS] f32
        prod = (u * t_rep).astype(jnp.bfloat16)                    # f32 VPU mul
        # per-BS-block reduction via a tiny summation matmul (keeps the reduce
        # on the MXU and avoids a last-dim-splitting reshape).
        acc = acc + jnp.dot(prod, sum_ref[...],
                            preferred_element_type=jnp.float32)    # [TN, R]

    logits = acc + bc_ref[...]                                     # [TN, R] f32
    mx = jnp.max(logits, axis=-1, keepdims=True)
    ridx = jax.lax.broadcasted_iota(jnp.int32, logits.shape, 1)
    cand = jnp.where(logits == mx, ridx, r)                        # first-max idx
    out_ref[...] = jnp.min(cand, axis=-1, keepdims=True).astype(jnp.int32)


# -------------------------------- wrappers ----------------------------------

def batched_ht_info(ha_all, ta_all, mask3, hs_bf16, ex_ids, tp=PAIR_TILE):
    # ha/ta: [P_tot, L] bf16 (per-example padded to multiples of tp, concatenated)
    # mask3: [B, 1, L] f32, hs_bf16: [B, L, H] bf16, ex_ids: [P_tot // tp] int32
    p_tot, l = ha_all.shape
    _, _, h = hs_bf16.shape
    n_tiles = p_tot // tp
    grid_spec = pltpu.PrefetchScalarGridSpec(
        num_scalar_prefetch=1,
        grid=(n_tiles,),
        in_specs=[
            pl.BlockSpec((tp, l), lambda p, ex: (p, 0)),
            pl.BlockSpec((tp, l), lambda p, ex: (p, 0)),
            pl.BlockSpec((1, 1, l), lambda p, ex: (ex[p], 0, 0)),
            pl.BlockSpec((1, l, h), lambda p, ex: (ex[p], 0, 0)),
        ],
        out_specs=pl.BlockSpec((tp, h), lambda p, ex: (p, 0)),
    )
    return pl.pallas_call(
        _ht_info_kernel,
        out_shape=jax.ShapeDtypeStruct((p_tot, h), jnp.bfloat16),
        grid_spec=grid_spec,
        compiler_params=pltpu.CompilerParams(
            dimension_semantics=("parallel",),
            vmem_limit_bytes=VMEM_LIMIT),
    )(ex_ids, ha_all, ta_all, mask3, hs_bf16)


def fused_dense_cls_argmax(xh, xt, w_h, b_h, w_t, b_t, cls_w, cls_b,
                           block_size=64, tn=PAIR_TILE):
    # xh/xt: [N_pad, F] bf16 (N_pad multiple of tn).  Returns [N_pad] int32.
    n_pad, f = xh.shape
    hdim = w_h.shape[1]
    g = hdim // block_size
    k, r = cls_w.shape
    assert k == hdim * block_size

    wh = w_h.astype(jnp.bfloat16)
    wt = w_t.astype(jnp.bfloat16)
    bh = b_h.reshape(1, hdim).astype(jnp.float32)
    bt = b_t.reshape(1, hdim).astype(jnp.float32)
    # cls_w[k, r] with k = g*BS*BS + a*BS + b  ->  wc[g, a, r*BS + b]
    wc = jnp.transpose(cls_w.reshape(g, block_size, block_size, r),
                       (0, 1, 3, 2)).reshape(g, block_size, r * block_size)
    wc = wc.astype(jnp.bfloat16)
    bc = cls_b.reshape(1, r).astype(jnp.float32)
    # summation matrix: sums each contiguous BS-wide block into one of R columns
    sum_mat = jnp.asarray(
        np.kron(np.eye(r, dtype=np.float32),
                np.ones((block_size, 1), np.float32))).astype(jnp.bfloat16)

    out = pl.pallas_call(
        _dense_cls_argmax_kernel,
        out_shape=jax.ShapeDtypeStruct((n_pad, 1), jnp.int32),
        grid=(n_pad // tn,),
        in_specs=[
            pl.BlockSpec((tn, f), lambda ni: (ni, 0)),
            pl.BlockSpec((tn, f), lambda ni: (ni, 0)),
            # weights/biases: constant block index -> DMA'd once, stay resident
            pl.BlockSpec((f, hdim), lambda ni: (0, 0)),
            pl.BlockSpec((1, hdim), lambda ni: (0, 0)),
            pl.BlockSpec((f, hdim), lambda ni: (0, 0)),
            pl.BlockSpec((1, hdim), lambda ni: (0, 0)),
            pl.BlockSpec((g, block_size, r * block_size), lambda ni: (0, 0, 0)),
            pl.BlockSpec((r * block_size, r), lambda ni: (0, 0)),
            pl.BlockSpec((1, r), lambda ni: (0, 0)),
        ],
        out_specs=pl.BlockSpec((tn, 1), lambda ni: (ni, 0)),
        compiler_params=pltpu.CompilerParams(
            dimension_semantics=("parallel",),
            vmem_limit_bytes=VMEM_LIMIT),
    )(xh, xt, wh, bh, wt, bt, wc, sum_mat, bc)
    return out[:, 0]


# --------------------------------- forward ----------------------------------

_DIST_TABLE = np.zeros(1024, dtype=np.int64)
for _thr, _val in [(2, 1), (4, 2), (8, 3), (16, 4), (32, 5),
                   (64, 6), (128, 7), (256, 8), (512, 9)]:
    _DIST_TABLE[_thr:] = _val


def _pad_rows(x, rows):
    return jnp.pad(x, ((0, rows - x.shape[0]), (0, 0)))


def extra_relation_forward(params, hidden_state, attention, ner_result, batch,
                           is_test=False, block_size=64):
    batch_size = hidden_state.shape[0]
    head, tail, entity_type = ner_result
    if is_test:
        entity_num = [len(x) for x in head]
    else:
        entity_num = batch['entity_nums']
    pair_num = [int(x) * (int(x) - 1) for x in entity_num]

    hs_bf16 = hidden_state.astype(jnp.bfloat16)                       # MXU copy
    mask3 = batch['attention_mask'].astype(jnp.float32)[:, None, :]   # [B,1,L]

    ha_chunks, ta_chunks, ex_tile_ids = [], [], []
    per_example = []   # (head_feat, tail_feat, head_type, tail_type, dis, p, p_pad)
    for i in range(batch_size):
        e = int(entity_num[i])
        if e < 2:
            continue
        h_idx = np.asarray(head[i])
        t_idx = np.asarray(tail[i])
        hs_i = hidden_state[i]                                        # [L, H]
        att_i = attention[i]                                          # [NH, L, L]
        # head-sum over the gathered rows only -- plain jnp (tiny, bytes-bound;
        # per-example pallas_calls would just pay dispatch/recompile cost).
        ent_att = 0.5 * (jnp.sum(att_i[:, h_idx, :], axis=0)
                         + jnp.sum(att_i[:, t_idx, :], axis=0))       # [E, L]
        ent_att = ent_att.astype(jnp.bfloat16)
        entity_feature = (0.5 * (hs_i[h_idx] + hs_i[t_idx])).astype(jnp.bfloat16)
        entity_type_feature = params['type_emb'][
            np.asarray(entity_type[i])].astype(jnp.bfloat16)
        hts = np.array(list(permutations(range(e), 2)), dtype=np.int64)
        p0, p1 = hts[:, 0], hts[:, 1]
        p = hts.shape[0]
        head_feature = entity_feature[p0]
        tail_feature = entity_feature[p1]
        head_type = entity_type_feature[p0]
        tail_type = entity_type_feature[p1]
        ht_distance = _DIST_TABLE[np.abs(t_idx[p0] - h_idx[p1])]
        ht_dis_emb = params['dis_emb'][ht_distance].astype(jnp.bfloat16)
        p_pad = ((p + PAIR_TILE - 1) // PAIR_TILE) * PAIR_TILE
        ha_chunks.append(_pad_rows(ent_att[p0], p_pad))               # bf16
        ta_chunks.append(_pad_rows(ent_att[p1], p_pad))
        ex_tile_ids.extend([i] * (p_pad // PAIR_TILE))
        per_example.append((head_feature, tail_feature, head_type, tail_type,
                            ht_dis_emb, p, p_pad))

    if is_test and not ha_chunks:
        return None, [jnp.array([], dtype=jnp.int32) for _ in range(batch_size)]

    # ---- one batched, tiled ht_info kernel for the whole batch (bf16 out) ----
    ha_all = jnp.concatenate(ha_chunks, axis=0)
    ta_all = jnp.concatenate(ta_chunks, axis=0)
    ex_ids = jnp.asarray(np.array(ex_tile_ids, dtype=np.int32))
    ht_info_all = batched_ht_info(ha_all, ta_all, mask3, hs_bf16, ex_ids)

    all_h_chunks, all_t_chunks = [], []
    off = 0
    for head_feature, tail_feature, head_type, tail_type, ht_dis_emb, p, p_pad \
            in per_example:
        ht_info = ht_info_all[off:off + p]
        all_h_chunks.append(jnp.concatenate(
            [head_feature, ht_info, head_type, ht_dis_emb], axis=-1))
        all_t_chunks.append(jnp.concatenate(
            [tail_feature, ht_info, tail_type, ht_dis_emb], axis=-1))
        off += p_pad
    all_h = jnp.concatenate(all_h_chunks, axis=0)                     # bf16 [N,F]
    all_t = jnp.concatenate(all_t_chunks, axis=0)

    n = all_h.shape[0]
    n_pad = ((n + PAIR_TILE - 1) // PAIR_TILE) * PAIR_TILE
    all_h = _pad_rows(all_h, n_pad)
    all_t = _pad_rows(all_t, n_pad)

    # ---- fused dense+tanh+GroupLinear+argmax (single Pallas kernel) ----
    pred = fused_dense_cls_argmax(all_h, all_t,
                                  params['h_dense_w'], params['h_dense_b'],
                                  params['t_dense_w'], params['t_dense_b'],
                                  params['cls_w'], params['cls_b'],
                                  block_size=block_size)[:n]
    # TODO(synk): CELoss is not defined in the reference module; loss is omitted
    # (if needed, emit the [N, R] logits as a second kernel output).
    loss = None
    split_points = [int(x) for x in np.cumsum(pair_num)[:-1]]
    preds = jnp.split(pred, split_points)
    return loss, preds


# ----------------------------------- main ------------------------------------

if __name__ == "__main__":
    B, NH, L, H = 2, 2, 16, 64          # block_size=64 must divide hidden_size
    DIS, TYP, TAG, REL, BS = 8, 8, 4, 16, 64
    key = jax.random.PRNGKey(0)
    keys = jax.random.split(key, 10)

    hidden_state = jax.random.normal(keys[0], (B, L, H), jnp.float32)
    attention = jax.random.uniform(keys[1], (B, NH, L, L), jnp.float32)

    params = dict(
        h_dense_w=0.05 * jax.random.normal(keys[2], (2 * H + DIS + TYP, H), jnp.float32),
        h_dense_b=0.05 * jax.random.normal(keys[3], (H,), jnp.float32),
        t_dense_w=0.05 * jax.random.normal(keys[4], (2 * H + DIS + TYP, H), jnp.float32),
        t_dense_b=0.05 * jax.random.normal(keys[5], (H,), jnp.float32),
        dis_emb=0.05 * jax.random.normal(keys[6], (20, DIS), jnp.float32),
        type_emb=0.05 * jax.random.normal(keys[7], (TAG, TYP), jnp.float32),
        cls_w=0.05 * jax.random.normal(keys[8], (H * BS, REL), jnp.float32),
        cls_b=0.05 * jax.random.normal(keys[9], (REL,), jnp.float32),
    )

    # Synthetic NER result: (head token idx, tail token idx, entity type) per example.
    head = [np.array([1, 5, 9]), np.array([0, 4, 8, 12])]
    tail = [np.array([2, 6, 10]), np.array([1, 5, 9, 13])]
    etype = [np.array([0, 1, 2]), np.array([1, 2, 3, 0])]

    mask = np.ones((B, L), np.float32)
    mask[1, 14:] = 0.0
    batch = {'entity_nums': [3, 4], 'attention_mask': jnp.asarray(mask)}

    loss, preds = extra_relation_forward(
        params, hidden_state, attention, (head, tail, etype), batch, is_test=False)

    for p in preds:
        jax.block_until_ready(p)
    print("KERNEL_OK")
</pallas_src>

<mosaic_0001>
module attributes {stable_mosaic.version = 11 : i64} {
  func.func @_ht_info_kernel(%arg0: i32, %arg1: memref<2xi32, #tpu.memory_space<smem>>, %arg2: memref<256x16xbf16, #tpu.memory_space<vmem>>, %arg3: memref<256x16xbf16, #tpu.memory_space<vmem>>, %arg4: memref<1x1x16xf32, #tpu.memory_space<vmem>>, %arg5: memref<1x16x64xbf16, #tpu.memory_space<vmem>>, %arg6: memref<256x64xbf16, #tpu.memory_space<vmem>>) attributes {dimension_semantics = [#tpu.dimension_semantics<parallel>], iteration_bounds = array<i64: 2>, scalar_prefetch = 1 : i64, scratch_operands = 0 : i64, tpu.core_type = #tpu.core_type<tc>, window_params = [{transform_indices = @transform_0, window_bounds = array<i64: 256, 16>}, {transform_indices = @transform_1, window_bounds = array<i64: 256, 16>}, {transform_indices = @transform_2, window_bounds = array<i64: 1, 1, 16>}, {transform_indices = @transform_3, window_bounds = array<i64: 1, 16, 64>}, {transform_indices = @transform_4, window_bounds = array<i64: 256, 64>}]} {
    %c0 = arith.constant 0 : index
    %c0_0 = arith.constant 0 : index
    %0 = vector.load %arg2[%c0, %c0_0] : memref<256x16xbf16, #tpu.memory_space<vmem>>, vector<256x16xbf16>
    %1 = arith.extf %0 : vector<256x16xbf16> to vector<256x16xf32>
    %c0_1 = arith.constant 0 : index
    %c0_2 = arith.constant 0 : index
    %2 = vector.load %arg3[%c0_1, %c0_2] : memref<256x16xbf16, #tpu.memory_space<vmem>>, vector<256x16xbf16>
    %3 = arith.extf %2 : vector<256x16xbf16> to vector<256x16xf32>
    %4 = arith.mulf %1, %3 : vector<256x16xf32>
    %c0_3 = arith.constant 0 : index
    %c0_4 = arith.constant 0 : index
    %c0_5 = arith.constant 0 : index
    %5 = vector.load %arg4[%c0_3, %c0_4, %c0_5] : memref<1x1x16xf32, #tpu.memory_space<vmem>>, vector<1x1x16xf32>
    %6 = vector.shape_cast %5 : vector<1x1x16xf32> to vector<1x16xf32>
    %7 = vector.broadcast %6 : vector<1x16xf32> to vector<256x16xf32>
    %8 = arith.mulf %4, %7 : vector<256x16xf32>
    %cst = arith.constant dense<0.000000e+00> : vector<256xf32>
    %9 = vector.multi_reduction <add>, %8, %cst [1] : vector<256x16xf32> to vector<256xf32>
    %10 = vector.shape_cast %9 : vector<256xf32> to vector<256x1xf32>
    %cst_6 = arith.constant 9.99999968E-21 : f32
    %11 = vector.broadcast %cst_6 : f32 to vector<256x1xf32>
    %12 = arith.addf %10, %11 : vector<256x1xf32>
    %13 = tpu.reciprocal %12 {approx = true} : vector<256x1xf32> -> vector<256x1xf32>
    %14 = vector.broadcast %13 : vector<256x1xf32> to vector<256x16xf32>
    %15 = arith.mulf %8, %14 : vector<256x16xf32>
    %16 = arith.truncf %15 : vector<256x16xf32> to vector<256x16xbf16>
    %c0_7 = arith.constant 0 : index
    %c0_8 = arith.constant 0 : index
    %c0_9 = arith.constant 0 : index
    %17 = vector.load %arg5[%c0_7, %c0_8, %c0_9] : memref<1x16x64xbf16, #tpu.memory_space<vmem>>, vector<1x16x64xbf16>
    %18 = vector.shape_cast %17 : vector<1x16x64xbf16> to vector<16x64xbf16>
    %cst_10 = arith.constant dense<0.000000e+00> : vector<256x64xf32>
    %19 = tpu.matmul %16, %18, %cst_10 {dimension_numbers = #tpu.dot_dimension_numbers<[1], [0], [0], [1], [0, 0, 1, 1], [], []>} : vector<256x16xbf16>, vector<16x64xbf16>, vector<256x64xf32> -> vector<256x64xf32>
    %20 = arith.truncf %19 : vector<256x64xf32> to vector<256x64xbf16>
    %c0_11 = arith.constant 0 : index
    %c0_12 = arith.constant 0 : index
    %21 = vector.load %arg6[%c0_11, %c0_12] : memref<256x64xbf16, #tpu.memory_space<vmem>>, vector<256x64xbf16>
    tpu.vector_store %arg6[%c0_11, %c0_12], %20 {strides = array<i32>} : memref<256x64xbf16, #tpu.memory_space<vmem>>, vector<256x64xbf16>,
    return
  }
  func.func @transform_0(%arg0: i32, %arg1: memref<2xi32, #tpu.memory_space<smem>>) -> (i32, i32) {
    %c0_i32 = arith.constant 0 : i32
    %c0_i32_0 = arith.constant 0 : i32
    return %arg0, %c0_i32 : i32, i32
  }
  func.func @transform_1(%arg0: i32, %arg1: memref<2xi32, #tpu.memory_space<smem>>) -> (i32, i32) {
    %c0_i32 = arith.constant 0 : i32
    %c0_i32_0 = arith.constant 0 : i32
    return %arg0, %c0_i32 : i32, i32
  }
  func.func @transform_2(%arg0: i32, %arg1: memref<2xi32, #tpu.memory_space<smem>>) -> (i32, i32, i32) {
    %0 = arith.index_cast %arg0 : i32 to index
    %1 = memref.load %arg1[%0] : memref<2xi32, #tpu.memory_space<smem>>
    %c0_i32 = arith.constant 0 : i32
    %c0_i32_0 = arith.constant 0 : i32
    %c0_i32_1 = arith.constant 0 : i32
    return %1, %c0_i32, %c0_i32_0 : i32, i32, i32
  }
  func.func @transform_3(%arg0: i32, %arg1: memref<2xi32, #tpu.memory_space<smem>>) -> (i32, i32, i32) {
    %0 = arith.index_cast %arg0 : i32 to index
    %1 = memref.load %arg1[%0] : memref<2xi32, #tpu.memory_space<smem>>
    %c0_i32 = arith.constant 0 : i32
    %c0_i32_0 = arith.constant 0 : i32
    %c0_i32_1 = arith.constant 0 : i32
    return %1, %c0_i32, %c0_i32_0 : i32, i32, i32
  }
  func.func @transform_4(%arg0: i32, %arg1: memref<2xi32, #tpu.memory_space<smem>>) -> (i32, i32) {
    %c0_i32 = arith.constant 0 : i32
    %c0_i32_0 = arith.constant 0 : i32
    return %arg0, %c0_i32 : i32, i32
  }
}

</mosaic_0001>

<bundles_post_ra>
// kernel: tpu_custom_call.1
= control target key start
LH: loop header
LB: loop body
LE: loop exit
PB: predicated region body
PF: predicated region fallthrough
CT: control target
= control target key end

     0   :  { %s1279_s21 = smov [#allocation3]   ;;  %s1669_s0 = inlined_call_operand.vmem [shape: s32[2], index: 0, kind: input, shape index: {}]   ;;  %s1670_s1 = inlined_call_operand.vmem [shape: bf16[512,16], index: 1, kind: input, shape index: {}]   ;;  %s1671_s2 = inlined_call_operand.vmem [shape: bf16[512,16], index: 2, kind: input, shape index: {}]   ;;  %s1672_s3 = inlined_call_operand.vmem [shape: f32[2,1,16], index: 3, kind: input, shape index: {}]   ;;  %s1673_s4 = inlined_call_operand.vmem [shape: bf16[2,16,64], index: 4, kind: input, shape index: {}]   ;;  %s1674_s5 = inlined_call_operand.vmem [shape: bf16[512,64], index: 5, kind: output, shape index: {}]  }
   0x1   :  { %s11_s20 = sshll.u32 %s1669_s0, 4  ;;  %s12_s20 = int_to_ptr.vmem [resolvable:$true] %s11_s20 }
   0x2   :  { %14 = dma.vmem_to_smem %s12_s20, 16, %s1279_s21, [#allocation2] }
   0x3   :  { %1273 = dma.done.wait [#allocation2], 16 }
   0x4   :  { %1274 = vsyncadd [#allocation2], 4294967280 }
   0x5   :  { %17 = sfence }
   0x6   :  { %s1313_s22 = smov 0  }
   0x7 LB: > { %s1319_s23 = sadd.s32 4294967295, %s1277_s22   ;;  %p989_p0 = scmp.ge.s32.totalorder %s1277_s22, 1  ;;  %s1277_s22 = sphi %s1313_s22, %s23_s22  }
   0x8   : > { %p209_p1 = scmp.lt.s32.totalorder %s1277_s22, 3 }
   0xa   : > { %p210_p2 = pnand %p989_p0, %p209_p1 }
   0xb   : > { %s990_s0 = sshll.u32 (!%p210_p2), %s1319_s23, 5  ;;  %s262_s24 = sld [smem:[#allocation3 + %s1319_s23]] (!%p210_p2) }
   0xc   : > { %213 = sbr.rel (%p210_p2) target bundleno = 377 (0x179), region = 36  ;;  %p251_p3 = scmp.lt.s32.totalorder (!%p210_p2), %s990_s0, 63 }
   0xd   : > { %s267_s10 = sld [smem:[#allocation3 + %s1319_s23]] (!%p210_p2) }
  0x11   : > { %s1676_s0 = smov (!%p251_p3, %s990_s0), 63  ;;  %p263_p4 = scmp.lt.s32.totalorder %s262_s24, 1  ;;  %vm477_vm0 = vcmask 130048   ;;  %vm863_vm1 = vcmask 519168  }
  0x12   : > { %s1325_s25 = sshll.u32 %s1676_s0, 2 }
  0x13   : > { %s1331_s28 = scalar_lea.vmem %s1670_s1, %s1325_s25  ;;  %s1337_s6 = scalar_lea.vmem %s1671_s2, %s1325_s25 }
  0x14   : > { %v1161_v0 = vld [vmem:[%s1331_s28 + $0x60] sm:$0xff]   ;;  %s1678_s24 = smov (!%p263_p4, %s262_s24), 1  ;;  %v1158_v33 = vld [vmem:[%s1331_s28 + $0x48] sm:$0xff]   ;;  %p268_p5 = scmp.lt.s32.totalorder %s267_s10, 1 }
  0x15   : > { %v1176_v1 = vld [vmem:[%s1337_s6 + $0x60] sm:$0xff]   ;;  %v1072_v3 = vunpack.c.l.bf16 %v1161_v0  ;;  %v1073_v9 = vunpack.c.h.bf16 %v1161_v0  ;;  %s265_s9 = scalar_lea.vmem %s1672_s3, %s1678_s24  ;;  %v1173_v34 = vld [vmem:[%s1337_s6 + $0x48] sm:$0xff]   ;;  %v1060_v42 = vunpack.c.l.bf16 %v1158_v33  ;;  %v1061_v56 = vunpack.c.h.bf16 %v1158_v33  ;;  %s1600_s17 = scalar_lea.vmem %s1674_s5, %s1325_s25 }
  0x16   : > { %v1157_v2 = vld [vmem:[%s1331_s28 + $0x40] sm:$0xff]   ;;  %v1136_v4 = vunpack.c.l.bf16 %v1176_v1  ;;  %v1137_v13 = vunpack.c.h.bf16 %v1176_v1  ;;  %v1124_v43 = vunpack.c.l.bf16 %v1173_v34  ;;  %v1162_v50 = vld [vmem:[%s1331_s28 + $0x68] sm:$0xff]   ;;  %v1125_v57 = vunpack.c.h.bf16 %v1173_v34  ;;  %s1680_s10 = smov (!%p268_p5, %s267_s10), 1 }
  0x17   : > { %v1056_v5 = vunpack.c.l.bf16 %v1157_v2  ;;  %v1172_v6 = vld [vmem:[%s1337_s6 + $0x40] sm:$0xff]   ;;  %v1057_v15 = vunpack.c.h.bf16 %v1157_v2  ;;  %v1177_v51 = vld [vmem:[%s1337_s6 + $0x68] sm:$0xff]   ;;  %v1076_v54 = vunpack.c.l.bf16 %v1162_v50  ;;  %v1077_v59 = vunpack.c.h.bf16 %v1162_v50  ;;  %s1020_s11 = sshll.u32 %s1680_s10, 3 }
  0x18   : > { %v1023_v7 = vld [vmem:[%s1331_s28] sm:$0xff]   ;;  %v1120_v10 = vunpack.c.l.bf16 %v1172_v6  ;;  %v433_v14 = vmul.f32 %v1136_v4, %v1072_v3  ;;  %v1121_v16 = vunpack.c.h.bf16 %v1172_v6  ;;  %v434_v22 = vmul.f32 %v1137_v13, %v1073_v9  ;;  %v1150_v1 = vld [vmem:[%s1331_s28 + $0x8] sm:$0xff]   ;;  %s272_s14 = scalar_lea.vmem %s1673_s4, %s1020_s11 }
  0x19   : > { %v1087_v8 = vld [vmem:[%s1337_s6] sm:$0xff]   ;;  %v1024_v11 = vunpack.c.l.bf16 %v1023_v7  ;;  %v1025_v19 = vunpack.c.h.bf16 %v1023_v7  ;;  %v427_v49 = vmul.f32 %v1124_v43, %v1060_v42  ;;  %v1140_v55 = vunpack.c.l.bf16 %v1177_v51  ;;  %v1165_v2 = vld [vmem:[%s1337_s6 + $0x8] sm:$0xff]  }
  0x1a   : > { %v1088_v12 = vunpack.c.l.bf16 %v1087_v8  ;;  %v425_v17 = vmul.f32 %v1120_v10, %v1056_v5  ;;  %v1089_v20 = vunpack.c.h.bf16 %v1087_v8  ;;  %v1348_v21 = vld [vmem:[%s265_s9] ss:$0 sm:$0xff]  ;;  %v426_v26 = vmul.f32 %v1121_v16, %v1057_v15  ;;  %v1154_v5 = vld [vmem:[%s1331_s28 + $0x28] sm:$0xff]  }
  0x1b   : > { %v1351_v23 = vmul.f32 %v1348_v21, %v433_v14  ;;  %v1153_v27 = vld [vmem:[%s1331_s28 + $0x20] sm:$0xff]   ;;  %v1370_v39 = vmul.f32 %v1348_v21, %v434_v22  ;;  %v1393_v58 = vmul.f32 %v1348_v21, %v427_v49  ;;  %v1141_v60 = vunpack.c.h.bf16 %v1177_v51  ;;  %v1169_v6 = vld [vmem:[%s1337_s6 + $0x28] sm:$0xff]   ;;  %v1174_v22 = vld [vmem:[%s1337_s6 + $0x50] sm:$0xff]  }
  0x1c   : > { %v409_v18 = vmul.f32 %v1088_v12, %v1024_v11  ;;  %v1354_v24 = vmul.f32 %v1348_v21, %v425_v17  ;;  %v1168_v28 = vld [vmem:[%s1337_s6 + $0x20] sm:$0xff]   ;;  %v410_v29 = vmul.f32 %v1089_v20, %v1025_v19  ;;  %v1041_v35 = vunpack.c.h.bf16 %v1153_v27  ;;  %v1159_v20 = vld [vmem:[%s1331_s28 + $0x50] sm:$0xff]  }
  0x1d   : > { %v550_v30 = vsel %vm477_vm0, %v1351_v23, 0.0  ;;  %v1105_v36 = vunpack.c.h.bf16 %v1168_v28  ;;  %v1040_v37 = vunpack.c.l.bf16 %v1153_v27  ;;  %v1104_v38 = vunpack.c.l.bf16 %v1168_v28 }
  0x1e   : > { %v1357_v25 = vmul.f32 %v1348_v21, %v409_v18  ;;  %v526_v31 = vsel %vm477_vm0, %v1354_v24, 0.0  ;;  %551 = vadd.xlane.f32.xlu1 %v550_v30  ;;  %v1373_v40 = vmul.f32 %v1348_v21, %v426_v26  ;;  %v1376_v41 = vmul.f32 %v1348_v21, %v410_v29 }
  0x1f   : > { %527 = vadd.xlane.f32.xlu0 %v526_v31  ;;  %v418_v44 = vmul.f32 %v1105_v36, %v1041_v35  ;;  %v417_v45 = vmul.f32 %v1104_v38, %v1040_v37  ;;  %v553_v46 = vsel %vm477_vm0, %v1370_v39, 0.0  ;;  %v435_v63 = vmul.f32 %v1140_v55, %v1076_v54  ;;  %v1160_v36 = vld [vmem:[%s1331_s28 + $0x58] sm:$0xff]   ;;  %v1163_v55 = vld [vmem:[%s1331_s28 + $0x70] sm:$0xff]  }
  0x20   : > { %v478_v32 = vsel %vm477_vm0, %v1357_v25, 0.0  ;;  %v529_v47 = vsel %vm477_vm0, %v1373_v40, 0.0  ;;  %v481_v48 = vsel %vm477_vm0, %v1376_v41, 0.0  ;;  %v428_v0 = vmul.f32 %v1125_v57, %v1061_v56  ;;  %v1175_v37 = vld [vmem:[%s1337_s6 + $0x58] sm:$0xff]   ;;  %v1178_v56 = vld [vmem:[%s1337_s6 + $0x70] sm:$0xff]  }
  0x21   : > { %479 = vadd.xlane.f32.xlu2 %v478_v32  ;;  %v1387_v52 = vmul.f32 %v1348_v21, %v418_v44  ;;  %v1390_v53 = vmul.f32 %v1348_v21, %v417_v45  ;;  %v532_v3 = vsel %vm477_vm0, %v1393_v58, 0.0  ;;  %v436_v4 = vmul.f32 %v1141_v60, %v1077_v59  ;;  %v1164_v38 = vld [vmem:[%s1331_s28 + $0x78] sm:$0xff]  }
  0x22   : > { %v1029_v7 = vunpack.c.h.bf16 %v1150_v1  ;;  %v1093_v8 = vunpack.c.h.bf16 %v1165_v2  ;;  %v1028_v9 = vunpack.c.l.bf16 %v1150_v1  ;;  %v1092_v10 = vunpack.c.l.bf16 %v1165_v2 }
  0x23   : > { %v505_v61 = vsel %vm477_vm0, %v1387_v52, 0.0  ;;  %v502_v62 = vsel %vm477_vm0, %v1390_v53, 0.0  ;;  %v1406_v11 = vmul.f32 %v1348_v21, %v435_v63  ;;  %v1409_v12 = vmul.f32 %v1348_v21, %v428_v0 }
  0x24   : > { %v1412_v13 = vmul.f32 %v1348_v21, %v436_v4  ;;  %v1044_v14 = vunpack.c.l.bf16 %v1154_v5  ;;  %v1108_v15 = vunpack.c.l.bf16 %v1169_v6  ;;  %v412_v16 = vmul.f32 %v1093_v8, %v1029_v7 }
  0x25   : > { %v411_v17 = vmul.f32 %v1092_v10, %v1028_v9  ;;  %v556_v18 = vsel %vm477_vm0, %v1406_v11, 0.0  ;;  %v535_v19 = vsel %vm477_vm0, %v1409_v12, 0.0  ;;  %v1064_v30 = vunpack.c.l.bf16 %v1159_v20 }
  0x26   : > { %554 = vadd.xlane.f32.xlu1 %v553_v46  ;;  %v559_v26 = vsel %vm477_vm0, %v1412_v13, 0.0  ;;  %v419_v27 = vmul.f32 %v1108_v15, %v1044_v14  ;;  %v1423_v28 = vmul.f32 %v1348_v21, %v412_v16  ;;  %v1128_v31 = vunpack.c.l.bf16 %v1174_v22  ;;  %v1179_v46 = vld [vmem:[%s1337_s6 + $0x78] sm:$0xff]  }
  0x27   : > { %530 = vadd.xlane.f32.xlu0 %v529_v47  ;;  %v1426_v29 = vmul.f32 %v1348_v21, %v411_v17  ;;  %v1045_v32 = vunpack.c.h.bf16 %v1154_v5  ;;  %v1109_v33 = vunpack.c.h.bf16 %v1169_v6  ;;  %v1065_v34 = vunpack.c.h.bf16 %v1159_v20  ;;  %v1152_v17 = vld [vmem:[%s1331_s28 + $0x18] sm:$0xff]  }
  0x28   : > { %v1129_v35 = vunpack.c.h.bf16 %v1174_v22  ;;  %v1432_v42 = vmul.f32 %v1348_v21, %v419_v27  ;;  %v1069_v43 = vunpack.c.h.bf16 %v1160_v36  ;;  %v1133_v44 = vunpack.c.h.bf16 %v1175_v37 }
  0x29   : > { %482 = vadd.xlane.f32.xlu2 %v481_v48  ;;  %v1068_v45 = vunpack.c.l.bf16 %v1160_v36  ;;  %v1132_v47 = vunpack.c.l.bf16 %v1175_v37  ;;  %v1084_v48 = vunpack.c.l.bf16 %v1164_v38  ;;  %v1148_v49 = vunpack.c.l.bf16 %v1179_v46 }
  0x2a   : > { %v487_v50 = vsel %vm477_vm0, %v1423_v28, 0.0  ;;  %v484_v51 = vsel %vm477_vm0, %v1426_v29, 0.0  ;;  %v429_v54 = vmul.f32 %v1128_v31, %v1064_v30  ;;  %v432_v57 = vmul.f32 %v1133_v44, %v1069_v43  ;;  %v1155_v43 = vld [vmem:[%s1331_s28 + $0x30] sm:$0xff]  }
  0x2b   : > { %v420_v59 = vmul.f32 %v1109_v33, %v1045_v32  ;;  %v430_v60 = vmul.f32 %v1129_v35, %v1065_v34  ;;  %v431_v63 = vmul.f32 %v1132_v47, %v1068_v45  ;;  %v439_v0 = vmul.f32 %v1148_v49, %v1084_v48  ;;  %v1170_v44 = vld [vmem:[%s1337_s6 + $0x30] sm:$0xff]  }
  0x2c   : > { %v508_v1 = vsel %vm477_vm0, %v1432_v42, 0.0  ;;  %v1450_v2 = vmul.f32 %v1348_v21, %v432_v57  ;;  %v1145_v4 = vunpack.c.h.bf16 %v1178_v56  ;;  %v1080_v7 = vunpack.c.l.bf16 %v1163_v55 }
  0x2d   : > { %v1453_v5 = vmul.f32 %v1348_v21, %v431_v63  ;;  %v1456_v6 = vmul.f32 %v1348_v21, %v439_v0  ;;  %v1144_v8 = vunpack.c.l.bf16 %v1178_v56  ;;  %v1461_v14 = vmul.f32 %v1348_v21, %v429_v54  ;;  %v1156_v63 = vld [vmem:[%s1331_s28 + $0x38] sm:$0xff]  }
  0x2e   : > { %506 = vadd.xlane.f32.xlu1 %v505_v61  ;;  %v1442_v61 = vld [vmem:[%s1331_s28 + $0x10] sm:$0xff]   ;;  %v1464_v15 = vmul.f32 %v1348_v21, %v420_v59  ;;  %v1467_v16 = vmul.f32 %v1348_v21, %v430_v60  ;;  %v1085_v22 = vunpack.c.h.bf16 %v1164_v38  ;;  %v1037_v30 = vunpack.c.h.bf16 %v1152_v17  ;;  %v1171_v0 = vld [vmem:[%s1337_s6 + $0x38] sm:$0xff]  }
  0x2f   : > { %503 = vadd.xlane.f32.xlu0 %v502_v62  ;;  %v1445_v62 = vld [vmem:[%s1337_s6 + $0x10] sm:$0xff]   ;;  %v1032_v9 = vunpack.c.l.bf16 %v1442_v61  ;;  %v437_v32 = vmul.f32 %v1144_v8, %v1080_v7  ;;  %v538_v36 = vsel %vm477_vm0, %v1461_v14, 0.0  ;;  %v1048_v54 = vunpack.c.l.bf16 %v1155_v43 }
  0x30   : > { %v1096_v10 = vunpack.c.l.bf16 %v1445_v62  ;;  %v511_v37 = vsel %vm477_vm0, %v1464_v15, 0.0  ;;  %v541_v38 = vsel %vm477_vm0, %v1467_v16, 0.0  ;;  %v1033_v56 = vunpack.c.h.bf16 %v1442_v61 }
  0x31   : > { %533 = vadd.xlane.f32.xlu2 %v532_v3  ;;  %v1081_v3 = vunpack.c.h.bf16 %v1163_v55  ;;  %v1112_v55 = vunpack.c.l.bf16 %v1170_v44  ;;  %v1097_v57 = vunpack.c.h.bf16 %v1445_v62  ;;  %v1049_v59 = vunpack.c.h.bf16 %v1155_v43 }
  0x32   : > { %v413_v33 = vmul.f32 %v1096_v10, %v1032_v9  ;;  %v1113_v60 = vunpack.c.h.bf16 %v1170_v44  ;;  %v1116_v7 = vunpack.c.l.bf16 %v1171_v0 }
  0x33   : > { %v438_v27 = vmul.f32 %v1145_v4, %v1081_v3  ;;  %v1117_v3 = vunpack.c.h.bf16 %v1171_v0  ;;  %v1052_v4 = vunpack.c.l.bf16 %v1156_v63  ;;  %v414_v61 = vmul.f32 %v1097_v57, %v1033_v56 }
  0x35   : > { %v1486_v48 = vmul.f32 %v1348_v21, %v438_v27  ;;  %v423_v9 = vmul.f32 %v1116_v7, %v1052_v4  ;;  %v1517_v27 = vmul.f32 %v1348_v21, %v414_v61 }
  0x36   : > { %557 = vadd.xlane.f32.xlu1 %v556_v18  ;;  %v1167_v18 = vld [vmem:[%s1337_s6 + $0x18] sm:$0xff]  }
  0x37   : > { %536 = vadd.xlane.f32.xlu0 %v535_v19  ;;  %v1036_v19 = vunpack.c.l.bf16 %v1152_v17  ;;  %v1100_v20 = vunpack.c.l.bf16 %v1167_v18  ;;  %v1101_v31 = vunpack.c.h.bf16 %v1167_v18  ;;  %v565_v10 = vsel %vm477_vm0, %v1486_v48, 0.0 }
  0x38   : > { %v421_v18 = vmul.f32 %v1112_v55, %v1048_v54 }
  0x39   : > { %560 = vadd.xlane.f32.xlu2 %v559_v26  ;;  %v1149_v26 = vunpack.c.h.bf16 %v1179_v46  ;;  %v415_v34 = vmul.f32 %v1100_v20, %v1036_v19  ;;  %v416_v45 = vmul.f32 %v1101_v31, %v1037_v30  ;;  %v422_v19 = vmul.f32 %v1113_v60, %v1049_v59 }
  0x3b   : > { %v440_v35 = vmul.f32 %v1149_v26, %v1085_v22  ;;  %v1480_v46 = vmul.f32 %v1348_v21, %v415_v34  ;;  %v1489_v49 = vmul.f32 %v1348_v21, %v416_v45  ;;  %v1511_v22 = vmul.f32 %v1348_v21, %v423_v9 }
  0x3c   : > { %v1514_v26 = vmul.f32 %v1348_v21, %v421_v18  ;;  %v1520_v30 = vmul.f32 %v1348_v21, %v422_v19  ;;  %v547_v34 = vsel %vm477_vm0, %v1450_v2, 0.0 }
  0x3d   : > { %v1483_v47 = vmul.f32 %v1348_v21, %v440_v35  ;;  %v568_v35 = vsel %vm477_vm0, %v1456_v6, 0.0  ;;  %v499_v43 = vsel %vm477_vm0, %v1489_v49, 0.0  ;;  %v520_v45 = vsel %vm477_vm0, %v1511_v22, 0.0 }
  0x3e   : > { %488 = vadd.xlane.f32.xlu1 %v487_v50  ;;  %v1492_v50 = vmul.f32 %v1348_v21, %v437_v32  ;;  %v514_v31 = vsel %vm477_vm0, %v1514_v26, 0.0  ;;  %v493_v32 = vsel %vm477_vm0, %v1517_v27, 0.0 }
  0x3f   : > { %485 = vadd.xlane.f32.xlu0 %v484_v51  ;;  %v1495_v51 = vmul.f32 %v1348_v21, %v413_v33  ;;  %v517_v33 = vsel %vm477_vm0, %v1520_v30, 0.0 }
  0x40   : > { %v562_v17 = vsel %vm477_vm0, %v1492_v50, 0.0 }
  0x41   : > { %509 = vadd.xlane.f32.xlu2 %v508_v1  ;;  %v1053_v1 = vunpack.c.h.bf16 %v1156_v63  ;;  %v490_v62 = vsel %vm477_vm0, %v1495_v51, 0.0 }
  0x43   : > { %v424_v8 = vmul.f32 %v1117_v3, %v1053_v1 }
  0x45   : > { %v1508_v20 = vmul.f32 %v1348_v21, %v424_v8  ;;  %v544_v21 = vsel %vm477_vm0, %v1453_v5, 0.0 }
  0x46   : > { %539 = vadd.xlane.f32.xlu1 %v538_v36  ;;  %v496_v36 = vsel %vm477_vm0, %v1480_v46, 0.0 }
  0x47   : > { %512 = vadd.xlane.f32.xlu0 %v511_v37  ;;  %v571_v37 = vsel %vm477_vm0, %v1483_v47, 0.0  ;;  %v523_v44 = vsel %vm477_vm0, %v1508_v20, 0.0 }
  0x49   : > { %542 = vadd.xlane.f32.xlu2 %v541_v38  ;;  %v1021_v38 = vld [vmem:[%s272_s14] sm:$0xff] }
  0x4a   : > { %749 = vmatpush.bf16.msra.mxu0 %v1021_v38  ;;  %1181 = vmatpush.bf16.msra.mxu2 %v1021_v38 }
  0x4b   : > { %1182 = vmatpush.bf16.msra.mxu3 %v1021_v38  ;;  %1180 = vmatpush.bf16.msra.mxu1 %v1021_v38 }
  0x4e   : > { %566 = vadd.xlane.f32.xlu1 %v565_v10 }
  0x4f   : > { %563 = vadd.xlane.f32.xlu0 %v562_v17 }
  0x51   : > { %491 = vadd.xlane.f32.xlu2 %v490_v62 }
  0x56   : > { %515 = vadd.xlane.f32.xlu1 %v514_v31 }
  0x57   : > { %494 = vadd.xlane.f32.xlu0 %v493_v32 }
  0x59   : > { %518 = vadd.xlane.f32.xlu2 %v517_v33 }
  0x5e   : > { %548 = vadd.xlane.f32.xlu1 %v547_v34 }
  0x5f   : > { %545 = vadd.xlane.f32.xlu0 %v544_v21 }
  0x61   : > { %569 = vadd.xlane.f32.xlu2 %v568_v35 }
  0x66   : > { %497 = vadd.xlane.f32.xlu1 %v496_v36 }
  0x67   : > { %572 = vadd.xlane.f32.xlu0 %v571_v37 }
  0x69   : > { %500 = vadd.xlane.f32.xlu2 %v499_v43 }
  0x6e   : > { %524 = vadd.xlane.f32.xlu1 %v523_v44 }
  0x6f   : > { %521 = vadd.xlane.f32.xlu0 %v520_v45 }
  0x91   : > { %v552_v54 = vpop.xlane.xlu1 %551 }
  0x92   : > { %v528_v55 = vpop.xlane.xlu0 %527  ;;  %v598_v57 = vadd.f32 1e-20, %v552_v54 }
  0x93   : > { %v590_v60 = vadd.f32 1e-20, %v528_v55 }
  0x94   : > { %v480_v56 = vpop.xlane.xlu2 %479  ;;  %1193 = vrcp.f32 %v598_v57 }
  0x95   : > { %v574_v59 = vadd.f32 1e-20, %v480_v56 }
  0x97   : > { %1195 = vrcp.f32 %v574_v59 }
  0x98   : > { %1197 = vrcp.f32 %v590_v60 }
  0x99   : > { %v555_v63 = vpop.xlane.xlu1 %554 }
  0x9a   : > { %v531_v0 = vpop.xlane.xlu0 %530  ;;  %v599_v1 = vadd.f32 1e-20, %v555_v63  ;;  %v1194_v8 = vpop.eup %1193 }
  0x9b   : > { %v591_v3 = vadd.f32 1e-20, %v531_v0  ;;  %v662_v34 = vmul.f32 %v1194_v8, %v1351_v23 }
  0x9c   : > { %v483_v4 = vpop.xlane.xlu2 %482  ;;  %1199 = vrcp.f32 %v599_v1 }
  0x9d   : > { %v575_v7 = vadd.f32 1e-20, %v483_v4  ;;  %1201 = vrcp.f32 %v591_v3  ;;  %v1196_v9 = vpop.eup %1195 }
  0x9e   : > { %v1198_v10 = vpop.eup %1197  ;;  %v638_v33 = vmul.f32 %v1196_v9, %v1357_v25 }
  0x9f   : > { %1203 = vrcp.f32 %v575_v7  ;;  %v654_v36 = vmul.f32 %v1198_v10, %v1354_v24 }
  0xa1   : > { %v507_v17 = vpop.xlane.xlu1 %506 }
  0xa2   : > { %v504_v18 = vpop.xlane.xlu0 %503  ;;  %v1200_v61 = vpop.eup %1199  ;;  %v583_v62 = vadd.f32 1e-20, %v507_v17 }
  0xa3   : > { %v582_v19 = vadd.f32 1e-20, %v504_v18  ;;  %v1202_v32 = vpop.eup %1201  ;;  %v663_v21 = vmul.f32 %v1200_v61, %v1370_v39 }
  0xa4   : > { %v534_v31 = vpop.xlane.xlu2 %533  ;;  %1205 = vrcp.f32 %v583_v62  ;;  %v655_v37 = vmul.f32 %v1202_v32, %v1373_v40 }
  0xa5   : > { %v1204_v35 = vpop.eup %1203  ;;  %1207 = vrcp.f32 %v582_v19  ;;  %v592_v43 = vadd.f32 1e-20, %v534_v31  ;;  %v682_v45 = vpack.c.bf16 %v663_v21, %v662_v34 }
  0xa6   : > { %v639_v44 = vmul.f32 %v1204_v35, %v1376_v41  ;;  %v678_v38 = vpack.c.bf16 %v655_v37, %v654_v36 }
  0xa7   : > { %1014 = vmatmul.msk.bf16.vlgmr.msra.gmra.mxu3 %vm477_vm0, %v682_v45  ;;  %1209 = vrcp.f32 %v592_v43 }
  0xa8   : > { %v670_v54 = vpack.c.bf16 %v639_v44, %v638_v33  ;;  %1010 = vmatmul.msk.bf16.vlgmr.msra.gmra.mxu2 %vm477_vm0, %v678_v38 }
  0xa9   : > { %v558_v23 = vpop.xlane.xlu1 %557 }
  0xaa   : > { %1002 = vmatmul.msk.bf16.vlgmr.msra.gmra.mxu0 %vm477_vm0, %v670_v54  ;;  %v537_v25 = vpop.xlane.xlu0 %536  ;;  %v1206_v39 = vpop.eup %1205  ;;  %v600_v24 = vadd.f32 1e-20, %v558_v23 }
  0xab   : > { %v593_v55 = vadd.f32 1e-20, %v537_v25  ;;  %v1208_v56 = vpop.eup %1207  ;;  %v647_v41 = vmul.f32 %v1206_v39, %v1387_v52 }
  0xac   : > { %v561_v40 = vpop.xlane.xlu2 %560  ;;  %1211 = vrcp.f32 %v600_v24  ;;  %v646_v59 = vmul.f32 %v1208_v56, %v1390_v53 }
  0xad   : > { %v601_v57 = vadd.f32 1e-20, %v561_v40  ;;  %1213 = vrcp.f32 %v593_v55  ;;  %v1210_v63 = vpop.eup %1209 }
  0xae   : > { %v674_v60 = vpack.c.bf16 %v647_v41, %v646_v59  ;;  %v656_v9 = vmul.f32 %v1210_v63, %v1393_v58 }
  0xaf   : > { %1215 = vrcp.f32 %v601_v57 }
  0xb0   : > { %1006 = vmatmul.msk.bf16.vlgmr.msra.gmra.mxu1 %vm477_vm0, %v674_v60 }
  0xb1   : > { %v489_v0 = vpop.xlane.xlu1 %488 }
  0xb2   : > { %v486_v1 = vpop.xlane.xlu0 %485  ;;  %v1212_v3 = vpop.eup %1211  ;;  %v577_v4 = vadd.f32 1e-20, %v489_v0 }
  0xb3   : > { %v576_v7 = vadd.f32 1e-20, %v486_v1  ;;  %v1214_v10 = vpop.eup %1213  ;;  %v664_v52 = vmul.f32 %v1212_v3, %v1406_v11 }
  0xb4   : > { %v510_v8 = vpop.xlane.xlu2 %509  ;;  %1217 = vrcp.f32 %v577_v4  ;;  %v657_v53 = vmul.f32 %v1214_v10, %v1409_v12 }
  0xb5   : > { %v1216_v17 = vpop.eup %1215  ;;  %1219 = vrcp.f32 %v576_v7  ;;  %v584_v18 = vadd.f32 1e-20, %v510_v8 }
  0xb6   : > { %v665_v61 = vmul.f32 %v1216_v17, %v1412_v13  ;;  %v679_v62 = vpack.c.bf16 %v657_v53, %v656_v9 }
  0xb7   : > { %1221 = vrcp.f32 %v584_v18 }
  0xb8   : > { %v683_v19 = vpack.c.bf16 %v665_v61, %v664_v52  ;;  %1011 = vmatmul.msk.bf16.gmra.mxu2 %vm477_vm0, %v679_v62 }
  0xb9   : > { %v540_v31 = vpop.xlane.xlu1 %539 }
  0xba   : > { %1015 = vmatmul.msk.bf16.gmra.mxu3 %vm477_vm0, %v683_v19  ;;  %v513_v58 = vpop.xlane.xlu0 %512  ;;  %v1218_v32 = vpop.eup %1217  ;;  %v594_v33 = vadd.f32 1e-20, %v540_v31 }
  0xbb   : > { %v585_v11 = vadd.f32 1e-20, %v513_v58  ;;  %v1220_v21 = vpop.eup %1219  ;;  %v641_v12 = vmul.f32 %v1218_v32, %v1423_v28 }
  0xbc   : > { %v543_v34 = vpop.xlane.xlu2 %542  ;;  %1223 = vrcp.f32 %v594_v33  ;;  %v640_v13 = vmul.f32 %v1220_v21, %v1426_v29 }
  0xbd   : > { %v595_v35 = vadd.f32 1e-20, %v543_v34  ;;  %1225 = vrcp.f32 %v585_v11  ;;  %v1222_v37 = vpop.eup %1221 }
  0xbe   : > { %v671_v36 = vpack.c.bf16 %v641_v12, %v640_v13  ;;  %v648_v25 = vmul.f32 %v1222_v37, %v1432_v42 }
  0xbf   : > { %1227 = vrcp.f32 %v595_v35 }
  0xc0   : > { %1003 = vmatmul.msk.bf16.gmra.mxu0 %vm477_vm0, %v671_v36 }
  0xc1   : > { %v567_v43 = vpop.xlane.xlu1 %566 }
  0xc2   : > { %v564_v44 = vpop.xlane.xlu0 %563  ;;  %v1224_v45 = vpop.eup %1223  ;;  %v603_v38 = vadd.f32 1e-20, %v567_v43 }
  0xc3   : > { %v602_v54 = vadd.f32 1e-20, %v564_v44  ;;  %v1226_v39 = vpop.eup %1225  ;;  %v658_v28 = vmul.f32 %v1224_v45, %v1461_v14 }
  0xc4   : > { %v492_v23 = vpop.xlane.xlu2 %491  ;;  %1229 = vrcp.f32 %v603_v38  ;;  %v649_v29 = vmul.f32 %v1226_v39, %v1464_v15 }
  0xc5   : > { %v1228_v24 = vpop.eup %1227  ;;  %1231 = vrcp.f32 %v602_v54  ;;  %v578_v55 = vadd.f32 1e-20, %v492_v23 }
  0xc6   : > { %v659_v40 = vmul.f32 %v1228_v24, %v1467_v16  ;;  %v675_v56 = vpack.c.bf16 %v649_v29, %v648_v25 }
  0xc7   : > { %1233 = vrcp.f32 %v578_v55 }
  0xc8   : > { %v680_v57 = vpack.c.bf16 %v659_v40, %v658_v28  ;;  %1007 = vmatmul.msk.bf16.gmra.mxu1 %vm477_vm0, %v675_v56 }
  0xc9   : > { %v516_v41 = vpop.xlane.xlu1 %515 }
  0xca   : > { %1012 = vmatmul.msk.bf16.gmra.mxu2 %vm477_vm0, %v680_v57  ;;  %v495_v42 = vpop.xlane.xlu0 %494  ;;  %v1230_v59 = vpop.eup %1229  ;;  %v586_v60 = vadd.f32 1e-20, %v516_v41 }
  0xcb   : > { %v579_v14 = vadd.f32 1e-20, %v495_v42  ;;  %v1232_v0 = vpop.eup %1231  ;;  %v667_v15 = vmul.f32 %v1230_v59, %v1486_v48 }
  0xcc   : > { %v519_v63 = vpop.xlane.xlu2 %518  ;;  %1235 = vrcp.f32 %v586_v60  ;;  %v666_v16 = vmul.f32 %v1232_v0, %v1492_v50 }
  0xcd   : > { %v587_v1 = vadd.f32 1e-20, %v519_v63  ;;  %1237 = vrcp.f32 %v579_v14  ;;  %v1234_v4 = vpop.eup %1233 }
  0xce   : > { %v684_v3 = vpack.c.bf16 %v667_v15, %v666_v16  ;;  %v642_v53 = vmul.f32 %v1234_v4, %v1495_v51 }
  0xcf   : > { %1239 = vrcp.f32 %v587_v1 }
  0xd0   : > { %1016 = vmatmul.msk.bf16.gmra.mxu3 %vm477_vm0, %v684_v3 }
  0xd1   : > { %v549_v7 = vpop.xlane.xlu1 %548 }
  0xd2   : > { %v546_v8 = vpop.xlane.xlu0 %545  ;;  %v1236_v9 = vpop.eup %1235  ;;  %v597_v10 = vadd.f32 1e-20, %v549_v7 }
  0xd3   : > { %v596_v52 = vadd.f32 1e-20, %v546_v8  ;;  %v1238_v18 = vpop.eup %1237  ;;  %v650_v48 = vmul.f32 %v1236_v9, %v1514_v26 }
  0xd4   : > { %v570_v17 = vpop.xlane.xlu2 %569  ;;  %1241 = vrcp.f32 %v597_v10  ;;  %v643_v50 = vmul.f32 %v1238_v18, %v1517_v27 }
  0xd5   : > { %v1240_v61 = vpop.eup %1239  ;;  %1243 = vrcp.f32 %v596_v52  ;;  %v604_v62 = vadd.f32 1e-20, %v570_v17 }
  0xd6   : > { %v651_v19 = vmul.f32 %v1240_v61, %v1520_v30  ;;  %v672_v31 = vpack.c.bf16 %v643_v50, %v642_v53 }
  0xd7   : > { %1245 = vrcp.f32 %v604_v62 }
  0xd8   : > { %v676_v58 = vpack.c.bf16 %v651_v19, %v650_v48  ;;  %1004 = vmatmul.msk.bf16.gmra.mxu0 %vm477_vm0, %v672_v31 }
  0xd9   : > { %v498_v32 = vpop.xlane.xlu1 %497 }
  0xda   : > { %1008 = vmatmul.msk.bf16.gmra.mxu1 %vm477_vm0, %v676_v58  ;;  %v573_v51 = vpop.xlane.xlu0 %572  ;;  %v1242_v33 = vpop.eup %1241  ;;  %v580_v11 = vadd.f32 1e-20, %v498_v32 }
  0xdb   : > { %v605_v26 = vadd.f32 1e-20, %v573_v51  ;;  %v1244_v21 = vpop.eup %1243  ;;  %v661_v27 = vmul.f32 %v1242_v33, %v1450_v2 }
  0xdc   : > { %v501_v34 = vpop.xlane.xlu2 %500  ;;  %1247 = vrcp.f32 %v580_v11  ;;  %v660_v30 = vmul.f32 %v1244_v21, %v1453_v5 }
  0xdd   : > { %v581_v35 = vadd.f32 1e-20, %v501_v34  ;;  %1249 = vrcp.f32 %v605_v26  ;;  %v1246_v13 = vpop.eup %1245 }
  0xde   : > { %v681_v12 = vpack.c.bf16 %v661_v27, %v660_v30  ;;  %v668_v38 = vmul.f32 %v1246_v13, %v1456_v6 }
  0xdf   : > { %1251 = vrcp.f32 %v581_v35 }
  0xe0   : > { %1013 = vmatmul.msk.bf16.gmra.mxu2 %vm477_vm0, %v681_v12 }
  0xe1   : > { %v525_v36 = vpop.xlane.xlu1 %524 }
  0xe2   : > { %v522_v37 = vpop.xlane.xlu0 %521  ;;  %v1248_v43 = vpop.eup %1247  ;;  %v589_v44 = vadd.f32 1e-20, %v525_v36 }
  0xe3   : > { %v588_v45 = vadd.f32 1e-20, %v522_v37  ;;  %v1250_v54 = vpop.eup %1249  ;;  %v644_v23 = vmul.f32 %v1248_v43, %v1480_v46 }
  0xe4   : > { %1253 = vrcp.f32 %v589_v44  ;;  %v669_v5 = vmul.f32 %v1250_v54, %v1483_v47 }
  0xe5   : > { %v1252_v2 = vpop.eup %1251  ;;  %1255 = vrcp.f32 %v588_v45 }
  0xe6   : > { %v645_v25 = vmul.f32 %v1252_v2, %v1489_v49  ;;  %v685_v39 = vpack.c.bf16 %v669_v5, %v668_v38 }
  0xe8   : > { %v673_v28 = vpack.c.bf16 %v645_v25, %v644_v23  ;;  %1017 = vmatmul.msk.bf16.gmra.mxu3 %vm477_vm0, %v685_v39 }
  0xea   : > { %1005 = vmatmul.msk.bf16.gmra.mxu0 %vm477_vm0, %v673_v28  ;;  %v1254_v24 = vpop.eup %1253 }
  0xeb   : > { %v1256_v29 = vpop.eup %1255  ;;  %v653_v6 = vmul.f32 %v1254_v24, %v1508_v20 }
  0xec   : > { %v652_v46 = vmul.f32 %v1256_v29, %v1511_v22 }
  0xee   : > { %v677_v55 = vpack.c.bf16 %v653_v6, %v652_v46 }
  0xf0   : > { %1009 = vmatmul.msk.bf16.gmra.mxu1 %vm477_vm0, %v677_v55 }
 0x127   : > { %v751_v47 = vpop.f32.mrf.mxu0 }
 0x128   : > { %v831_v49 = vpack.c.bf16 %v751_v47, %v751_v47 }
 0x12a   : > { %864 = vst.msk [vmem:[%s1600_s17] sm:$0xf] %vm863_vm1, %v831_v49  ;;  %v811_v20 = vpop.f32.mrf.mxu3 }
 0x12b   : > { %v791_v22 = vpop.f32.mrf.mxu2  ;;  %v855_v40 = vpack.c.bf16 %v811_v20, %v811_v20 }
 0x12c   : > { %v847_v56 = vpack.c.bf16 %v791_v22, %v791_v22 }
 0x12d   : > { %888 = vst.msk [vmem:[%s1600_s17 + $0x60] sm:$0xf] %vm863_vm1, %v855_v40  ;;  %v771_v57 = vpop.f32.mrf.mxu1 }
 0x12e   : > { %880 = vst.msk [vmem:[%s1600_s17 + $0x40] sm:$0xf] %vm863_vm1, %v847_v56  ;;  %v839_v42 = vpack.c.bf16 %v771_v57, %v771_v57 }
 0x12f   : > { %v753_v41 = vpop.f32.mrf.mxu0 }
 0x130   : > { %v832_v59 = vpack.c.bf16 %v753_v41, %v753_v41  ;;  %872 = vst.msk [vmem:[%s1600_s17 + $0x20] sm:$0xf] %vm863_vm1, %v839_v42 }
 0x132   : > { %865 = vst.msk [vmem:[%s1600_s17 + $0x4] sm:$0xf] %vm863_vm1, %v832_v59  ;;  %v813_v60 = vpop.f32.mrf.mxu3 }
 0x133   : > { %v793_v14 = vpop.f32.mrf.mxu2  ;;  %v856_v63 = vpack.c.bf16 %v813_v60, %v813_v60 }
 0x134   : > { %v848_v0 = vpack.c.bf16 %v793_v14, %v793_v14 }
 0x135   : > { %889 = vst.msk [vmem:[%s1600_s17 + $0x64] sm:$0xf] %vm863_vm1, %v856_v63  ;;  %v773_v1 = vpop.f32.mrf.mxu1 }
 0x136   : > { %881 = vst.msk [vmem:[%s1600_s17 + $0x44] sm:$0xf] %vm863_vm1, %v848_v0  ;;  %v840_v15 = vpack.c.bf16 %v773_v1, %v773_v1 }
 0x138   : > { %873 = vst.msk [vmem:[%s1600_s17 + $0x24] sm:$0xf] %vm863_vm1, %v840_v15 }
 0x13b   : > { %v796_v16 = vpop.f32.mrf.mxu2 }
 0x13c   : > { %v849_v3 = vpack.c.bf16 %v796_v16, %v796_v16 }
 0x13d   : > { %v816_v4 = vpop.f32.mrf.mxu3  ;;  %v756_v8 = vpop.f32.mrf.mxu0 }
 0x13e   : > { %v857_v7 = vpack.c.bf16 %v816_v4, %v816_v4  ;;  %882 = vst.msk [vmem:[%s1600_s17 + $0x48] sm:$0xf] %vm863_vm1, %v849_v3  ;;  %v833_v9 = vpack.c.bf16 %v756_v8, %v756_v8 }
 0x140   : > { %890 = vst.msk [vmem:[%s1600_s17 + $0x68] sm:$0xf] %vm863_vm1, %v857_v7 }
 0x141   : > { %866 = vst.msk [vmem:[%s1600_s17 + $0x8] sm:$0xf] %vm863_vm1, %v833_v9 }
 0x143   : > { %v798_v10 = vpop.f32.mrf.mxu2 }
 0x144   : > { %v850_v52 = vpack.c.bf16 %v798_v10, %v798_v10 }
 0x145   : > { %v818_v17 = vpop.f32.mrf.mxu3  ;;  %v758_v18 = vpop.f32.mrf.mxu0 }
 0x146   : > { %v858_v53 = vpack.c.bf16 %v818_v17, %v818_v17  ;;  %v776_v48 = vpop.f32.mrf.mxu1  ;;  %883 = vst.msk [vmem:[%s1600_s17 + $0x4c] sm:$0xf] %vm863_vm1, %v850_v52  ;;  %v834_v61 = vpack.c.bf16 %v758_v18, %v758_v18 }
 0x147   : > { %v841_v50 = vpack.c.bf16 %v776_v48, %v776_v48 }
 0x148   : > { %891 = vst.msk [vmem:[%s1600_s17 + $0x6c] sm:$0xf] %vm863_vm1, %v858_v53 }
 0x149   : > { %867 = vst.msk [vmem:[%s1600_s17 + $0xc] sm:$0xf] %vm863_vm1, %v834_v61 }
 0x14a   : > { %874 = vst.msk [vmem:[%s1600_s17 + $0x28] sm:$0xf] %vm863_vm1, %v841_v50 }
 0x14d   : > { %v801_v62 = vpop.f32.mrf.mxu2 }
 0x14e   : > { %v851_v19 = vpack.c.bf16 %v801_v62, %v801_v62  ;;  %v778_v31 = vpop.f32.mrf.mxu1 }
 0x14f   : > { %v842_v58 = vpack.c.bf16 %v778_v31, %v778_v31 }
 0x150   : > { %884 = vst.msk [vmem:[%s1600_s17 + $0x50] sm:$0xf] %vm863_vm1, %v851_v19 }
 0x151   : > { %875 = vst.msk [vmem:[%s1600_s17 + $0x2c] sm:$0xf] %vm863_vm1, %v842_v58 }
 0x153   : > { %v821_v32 = vpop.f32.mrf.mxu3 }
 0x154   : > { %v859_v33 = vpack.c.bf16 %v821_v32, %v821_v32 }
 0x155   : > { %v803_v51 = vpop.f32.mrf.mxu2  ;;  %v761_v26 = vpop.f32.mrf.mxu0 }
 0x156   : > { %v852_v11 = vpack.c.bf16 %v803_v51, %v803_v51  ;;  %892 = vst.msk [vmem:[%s1600_s17 + $0x70] sm:$0xf] %vm863_vm1, %v859_v33  ;;  %v835_v34 = vpack.c.bf16 %v761_v26, %v761_v26 }
 0x157   : > { %v781_v21 = vpop.f32.mrf.mxu1 }
 0x158   : > { %885 = vst.msk [vmem:[%s1600_s17 + $0x54] sm:$0xf] %vm863_vm1, %v852_v11  ;;  %v843_v35 = vpack.c.bf16 %v781_v21, %v781_v21 }
 0x159   : > { %868 = vst.msk [vmem:[%s1600_s17 + $0x10] sm:$0xf] %vm863_vm1, %v835_v34 }
 0x15a   : > { %876 = vst.msk [vmem:[%s1600_s17 + $0x30] sm:$0xf] %vm863_vm1, %v843_v35 }
 0x15b   : > { %v823_v27 = vpop.f32.mrf.mxu3 }
 0x15c   : > { %v860_v30 = vpack.c.bf16 %v823_v27, %v823_v27 }
 0x15d   : > { %v763_v12 = vpop.f32.mrf.mxu0 }
 0x15e   : > { %893 = vst.msk [vmem:[%s1600_s17 + $0x74] sm:$0xf] %vm863_vm1, %v860_v30  ;;  %v836_v13 = vpack.c.bf16 %v763_v12, %v763_v12 }
 0x15f   : > { %v783_v36 = vpop.f32.mrf.mxu1 }
 0x160   : > { %v844_v37 = vpack.c.bf16 %v783_v36, %v783_v36  ;;  %869 = vst.msk [vmem:[%s1600_s17 + $0x14] sm:$0xf] %vm863_vm1, %v836_v13 }
 0x162   : > { %877 = vst.msk [vmem:[%s1600_s17 + $0x34] sm:$0xf] %vm863_vm1, %v844_v37 }
 0x163   : > { %v806_v43 = vpop.f32.mrf.mxu2 }
 0x164   : > { %v853_v44 = vpack.c.bf16 %v806_v43, %v806_v43 }
 0x166   : > { %886 = vst.msk [vmem:[%s1600_s17 + $0x58] sm:$0xf] %vm863_vm1, %v853_v44 }
 0x167   : > { %v766_v45 = vpop.f32.mrf.mxu0 }
 0x168   : > { %v837_v38 = vpack.c.bf16 %v766_v45, %v766_v45 }
 0x16a   : > { %870 = vst.msk [vmem:[%s1600_s17 + $0x18] sm:$0xf] %vm863_vm1, %v837_v38 }
 0x16b   : > { %v808_v54 = vpop.f32.mrf.mxu2  ;;  %v826_v23 = vpop.f32.mrf.mxu3 }
 0x16c   : > { %v854_v2 = vpack.c.bf16 %v808_v54, %v808_v54  ;;  %v861_v5 = vpack.c.bf16 %v826_v23, %v826_v23 }
 0x16d   : > { %v786_v25 = vpop.f32.mrf.mxu1 }
 0x16e   : > { %887 = vst.msk [vmem:[%s1600_s17 + $0x5c] sm:$0xf] %vm863_vm1, %v854_v2  ;;  %v845_v28 = vpack.c.bf16 %v786_v25, %v786_v25 }
 0x16f   : > { %v768_v39 = vpop.f32.mrf.mxu0  ;;  %894 = vst.msk [vmem:[%s1600_s17 + $0x78] sm:$0xf] %vm863_vm1, %v861_v5 }
 0x170   : > { %v838_v24 = vpack.c.bf16 %v768_v39, %v768_v39  ;;  %878 = vst.msk [vmem:[%s1600_s17 + $0x38] sm:$0xf] %vm863_vm1, %v845_v28 }
 0x172   : > { %871 = vst.msk [vmem:[%s1600_s17 + $0x1c] sm:$0xf] %vm863_vm1, %v838_v24 }
 0x173   : > { %v828_v29 = vpop.f32.mrf.mxu3 }
 0x174   : > { %v862_v6 = vpack.c.bf16 %v828_v29, %v828_v29 }
 0x175   : > { %v788_v46 = vpop.f32.mrf.mxu1 }
 0x176   : > { %895 = vst.msk [vmem:[%s1600_s17 + $0x7c] sm:$0xf] %vm863_vm1, %v862_v6  ;;  %v846_v55 = vpack.c.bf16 %v788_v46, %v788_v46 }
 0x178   : > { %879 = vst.msk [vmem:[%s1600_s17 + $0x3c] sm:$0xf] %vm863_vm1, %v846_v55 }
 0x179 PF: > { %s23_s22 = sadd.s32 1, %s1277_s22  }
 0x17a   : > { %p20_p6 = scmp.ge.s32.totalorder %s23_s22, 4  }
 0x17c   :  { %22 = sbr.rel (!%p20_p6) target bundleno = 7 (0x7), region = 75 }

</bundles_post_ra>
